<compile_context>
chip_gen: v5e
topology: v5e:2x2
jax: 0.10.0
libtpu: 0.0.40
codegen_flags: <defaults>
</compile_context>

<pallas_src>
import jax
import jax.numpy as jnp
from jax.experimental import pallas as pl
from jax.experimental.pallas import tpu as pltpu

N_IN = 32
N_OUT = 2
H1, H2, H3 = 200, 500, 200        # logical hidden sizes (PyTorch module)
P1, P2, P3 = 256, 512, 256        # padded hidden sizes (MXU / 128-lane friendly)


def _round_up(x, m):
    return (x + m - 1) // m * m


def _mlp_kernel(x_ref,
                w1_ref, b1_ref,
                w2_ref, b2_ref,
                w3_ref, b3_ref,
                w4_ref, b4_ref,
                o_ref):
    """Fused 4-layer MLP forward on one batch tile.

    Weights are bf16 (MXU-native), accumulation and elementwise math are f32.
    All feature dims are pre-padded to 128-multiples; padded lanes stay 0.
    """
    x = x_ref[...].astype(jnp.bfloat16)

    # Layer 1: (TB, n_in) @ (n_in, 256) + b1, ReLU
    h = jnp.dot(x, w1_ref[...], preferred_element_type=jnp.float32) + b1_ref[...]
    h = jnp.maximum(h, 0.0)

    # Layer 2: (TB, 256) @ (256, 512) + b2, ReLU
    h = jnp.dot(h.astype(jnp.bfloat16), w2_ref[...],
                preferred_element_type=jnp.float32) + b2_ref[...]
    h = jnp.maximum(h, 0.0)

    # Layer 3: (TB, 512) @ (512, 256) + b3, ReLU
    h = jnp.dot(h.astype(jnp.bfloat16), w3_ref[...],
                preferred_element_type=jnp.float32) + b3_ref[...]
    h = jnp.maximum(h, 0.0)

    # Layer 4: (TB, 256) @ (256, 128) + b4   (n_out padded to 128 -> lane-dense store)
    out = jnp.dot(h.astype(jnp.bfloat16), w4_ref[...],
                  preferred_element_type=jnp.float32) + b4_ref[...]

    o_ref[...] = out.astype(o_ref.dtype)


def mlp_multistep_forward(x, padded_params, n_out=N_OUT, *, tb=512):
    """x: (B, n_in) float32; padded_params from pad_and_cast_params()."""
    B, n_in = x.shape
    p_out = padded_params["w4"].shape[1]

    # Batch tile: big tiles amortize per-step overhead; clamp for small B.
    TB = min(tb, _round_up(B, 8))
    B_pad = _round_up(B, TB)
    if B_pad != B:
        x = jnp.pad(x, ((0, B_pad - B), (0, 0)))
    grid = (B_pad // TB,)

    operands = (
        x,
        padded_params["w1"], padded_params["b1"],
        padded_params["w2"], padded_params["b2"],
        padded_params["w3"], padded_params["b3"],
        padded_params["w4"], padded_params["b4"],
    )

    x_spec = pl.BlockSpec((TB, n_in), lambda i: (i, 0))
    out_spec = pl.BlockSpec((TB, p_out), lambda i: (i, 0))
    # Weights/biases: full-array block, constant index -> stay resident in VMEM.
    weight_specs = [pl.BlockSpec(a.shape, lambda i: (0, 0)) for a in operands[1:]]

    flops = 2 * B_pad * (n_in * H1 + H1 * H2 + H2 * H3 + H3 * n_out)
    bytes_accessed = (
        x.size * x.dtype.itemsize
        + sum(a.size * a.dtype.itemsize for a in operands[1:])
        + B_pad * p_out * 4
    )

    out = pl.pallas_call(
        _mlp_kernel,
        out_shape=jax.ShapeDtypeStruct((B_pad, p_out), jnp.float32),
        grid=grid,
        in_specs=[x_spec] + weight_specs,
        out_specs=out_spec,
        compiler_params=pltpu.CompilerParams(
            dimension_semantics=("parallel",)),
        cost_estimate=pl.CostEstimate(
            flops=flops, transcendentals=0, bytes_accessed=bytes_accessed),
    )(*operands)

    return out[:B, :n_out]


def init_params(key, n_in=N_IN, n_out=N_OUT):
    """PyTorch nn.Linear default init U(-1/sqrt(fan_in), +...), logical shapes."""
    dims = [(n_in, H1), (H1, H2), (H2, H3), (H3, n_out)]
    params = {}
    for i, (fan_in, fan_out) in enumerate(dims, start=1):
        key, kw, kb = jax.random.split(key, 3)
        bound = 1.0 / jnp.sqrt(fan_in)
        params[f"w{i}"] = jax.random.uniform(
            kw, (fan_in, fan_out), jnp.float32, -bound, bound)
        params[f"b{i}"] = jax.random.uniform(
            kb, (fan_out,), jnp.float32, -bound, bound)
    return params


def pad_and_cast_params(params, n_in=N_IN, n_out=N_OUT):
    """Zero-pad feature dims to 128-multiples; weights -> bf16, biases stay f32."""
    p_out = _round_up(max(n_out, 128), 128)
    padded_dims = [(n_in, P1), (P1, P2), (P2, P3), (P3, p_out)]
    logical_dims = [(n_in, H1), (H1, H2), (H2, H3), (H3, n_out)]
    out = {}
    for i, ((pi, po), (li, lo)) in enumerate(zip(padded_dims, logical_dims), 1):
        w = jnp.zeros((pi, po), jnp.float32).at[:li, :lo].set(params[f"w{i}"])
        b = jnp.zeros((1, po), jnp.float32).at[0, :lo].set(params[f"b{i}"])
        out[f"w{i}"] = w.astype(jnp.bfloat16)   # MXU-native operand dtype
        out[f"b{i}"] = b                        # f32 bias add on the VPU
    return out


def _reference_forward(x, padded_params, n_out=N_OUT):
    """Pure-JAX mirror of the kernel math (bf16 matmul operands, f32 accum)."""
    def lin(h, w, b):
        return jnp.dot(h.astype(jnp.bfloat16), w,
                       preferred_element_type=jnp.float32) + b
    h = jnp.maximum(lin(x, padded_params["w1"], padded_params["b1"]), 0.0)
    h = jnp.maximum(lin(h, padded_params["w2"], padded_params["b2"]), 0.0)
    h = jnp.maximum(lin(h, padded_params["w3"], padded_params["b3"]), 0.0)
    out = lin(h, padded_params["w4"], padded_params["b4"])
    return out[:, :n_out]


if __name__ == "__main__":
    key = jax.random.PRNGKey(0)
    key, kx = jax.random.split(key)

    B = 8
    x = jax.random.normal(kx, (B, N_IN), jnp.float32)

    params = init_params(key)
    pparams = pad_and_cast_params(params)

    out = mlp_multistep_forward(x, pparams)
    out = jax.block_until_ready(out)

    ref = _reference_forward(x, pparams)
    assert out.shape == (B, N_OUT), out.shape
    assert jnp.allclose(out, ref, atol=1e-2, rtol=1e-2), "mismatch vs reference"

    print("KERNEL_OK")
</pallas_src>

<mosaic_0001>
module attributes {stable_mosaic.version = 11 : i64} {
  func.func @_mlp_kernel(%arg0: i32, %arg1: memref<8x32xf32, #tpu.memory_space<vmem>>, %arg2: memref<32x256xbf16, #tpu.memory_space<vmem>>, %arg3: memref<1x256xf32, #tpu.memory_space<vmem>>, %arg4: memref<256x512xbf16, #tpu.memory_space<vmem>>, %arg5: memref<1x512xf32, #tpu.memory_space<vmem>>, %arg6: memref<512x256xbf16, #tpu.memory_space<vmem>>, %arg7: memref<1x256xf32, #tpu.memory_space<vmem>>, %arg8: memref<256x128xbf16, #tpu.memory_space<vmem>>, %arg9: memref<1x128xf32, #tpu.memory_space<vmem>>, %arg10: memref<8x128xf32, #tpu.memory_space<vmem>>) attributes {dimension_semantics = [#tpu.dimension_semantics<parallel>], iteration_bounds = array<i64: 1>, scalar_prefetch = 0 : i64, scratch_operands = 0 : i64, tpu.core_type = #tpu.core_type<tc>, window_params = [{transform_indices = @transform_0, window_bounds = array<i64: 8, 32>}, {pipeline_mode = #tpu.pipeline_mode<synchronous>, transform_indices = @transform_1, window_bounds = array<i64: 32, 256>}, {pipeline_mode = #tpu.pipeline_mode<synchronous>, transform_indices = @transform_2, window_bounds = array<i64: 1, 256>}, {pipeline_mode = #tpu.pipeline_mode<synchronous>, transform_indices = @transform_3, window_bounds = array<i64: 256, 512>}, {pipeline_mode = #tpu.pipeline_mode<synchronous>, transform_indices = @transform_4, window_bounds = array<i64: 1, 512>}, {pipeline_mode = #tpu.pipeline_mode<synchronous>, transform_indices = @transform_5, window_bounds = array<i64: 512, 256>}, {pipeline_mode = #tpu.pipeline_mode<synchronous>, transform_indices = @transform_6, window_bounds = array<i64: 1, 256>}, {pipeline_mode = #tpu.pipeline_mode<synchronous>, transform_indices = @transform_7, window_bounds = array<i64: 256, 128>}, {pipeline_mode = #tpu.pipeline_mode<synchronous>, transform_indices = @transform_8, window_bounds = array<i64: 1, 128>}, {transform_indices = @transform_9, window_bounds = array<i64: 8, 128>}]} {
    %c0 = arith.constant 0 : index
    %c0_0 = arith.constant 0 : index
    %0 = vector.load %arg1[%c0, %c0_0] : memref<8x32xf32, #tpu.memory_space<vmem>>, vector<8x32xf32>
    %1 = arith.truncf %0 : vector<8x32xf32> to vector<8x32xbf16>
    %c0_1 = arith.constant 0 : index
    %c0_2 = arith.constant 0 : index
    %2 = vector.load %arg2[%c0_1, %c0_2] : memref<32x256xbf16, #tpu.memory_space<vmem>>, vector<32x256xbf16>
    %cst = arith.constant dense<0.000000e+00> : vector<8x256xf32>
    %3 = tpu.matmul %1, %2, %cst {dimension_numbers = #tpu.dot_dimension_numbers<[1], [0], [0], [1], [0, 0, 1, 1], [], []>} : vector<8x32xbf16>, vector<32x256xbf16>, vector<8x256xf32> -> vector<8x256xf32>
    %c0_3 = arith.constant 0 : index
    %c0_4 = arith.constant 0 : index
    %4 = vector.load %arg3[%c0_3, %c0_4] : memref<1x256xf32, #tpu.memory_space<vmem>>, vector<1x256xf32>
    %5 = vector.broadcast %4 : vector<1x256xf32> to vector<8x256xf32>
    %6 = arith.addf %3, %5 : vector<8x256xf32>
    %cst_5 = arith.constant 0.000000e+00 : f32
    %7 = vector.broadcast %cst_5 : f32 to vector<8x256xf32>
    %8 = arith.maximumf %6, %7 : vector<8x256xf32>
    %9 = arith.truncf %8 : vector<8x256xf32> to vector<8x256xbf16>
    %c0_6 = arith.constant 0 : index
    %c0_7 = arith.constant 0 : index
    %10 = vector.load %arg4[%c0_6, %c0_7] : memref<256x512xbf16, #tpu.memory_space<vmem>>, vector<256x512xbf16>
    %cst_8 = arith.constant dense<0.000000e+00> : vector<8x512xf32>
    %11 = tpu.matmul %9, %10, %cst_8 {dimension_numbers = #tpu.dot_dimension_numbers<[1], [0], [0], [1], [0, 0, 1, 1], [], []>} : vector<8x256xbf16>, vector<256x512xbf16>, vector<8x512xf32> -> vector<8x512xf32>
    %c0_9 = arith.constant 0 : index
    %c0_10 = arith.constant 0 : index
    %12 = vector.load %arg5[%c0_9, %c0_10] : memref<1x512xf32, #tpu.memory_space<vmem>>, vector<1x512xf32>
    %13 = vector.broadcast %12 : vector<1x512xf32> to vector<8x512xf32>
    %14 = arith.addf %11, %13 : vector<8x512xf32>
    %cst_11 = arith.constant 0.000000e+00 : f32
    %15 = vector.broadcast %cst_11 : f32 to vector<8x512xf32>
    %16 = arith.maximumf %14, %15 : vector<8x512xf32>
    %17 = arith.truncf %16 : vector<8x512xf32> to vector<8x512xbf16>
    %c0_12 = arith.constant 0 : index
    %c0_13 = arith.constant 0 : index
    %18 = vector.load %arg6[%c0_12, %c0_13] : memref<512x256xbf16, #tpu.memory_space<vmem>>, vector<512x256xbf16>
    %cst_14 = arith.constant dense<0.000000e+00> : vector<8x256xf32>
    %19 = tpu.matmul %17, %18, %cst_14 {dimension_numbers = #tpu.dot_dimension_numbers<[1], [0], [0], [1], [0, 0, 1, 1], [], []>} : vector<8x512xbf16>, vector<512x256xbf16>, vector<8x256xf32> -> vector<8x256xf32>
    %c0_15 = arith.constant 0 : index
    %c0_16 = arith.constant 0 : index
    %20 = vector.load %arg7[%c0_15, %c0_16] : memref<1x256xf32, #tpu.memory_space<vmem>>, vector<1x256xf32>
    %21 = vector.broadcast %20 : vector<1x256xf32> to vector<8x256xf32>
    %22 = arith.addf %19, %21 : vector<8x256xf32>
    %cst_17 = arith.constant 0.000000e+00 : f32
    %23 = vector.broadcast %cst_17 : f32 to vector<8x256xf32>
    %24 = arith.maximumf %22, %23 : vector<8x256xf32>
    %25 = arith.truncf %24 : vector<8x256xf32> to vector<8x256xbf16>
    %c0_18 = arith.constant 0 : index
    %c0_19 = arith.constant 0 : index
    %26 = vector.load %arg8[%c0_18, %c0_19] : memref<256x128xbf16, #tpu.memory_space<vmem>>, vector<256x128xbf16>
    %cst_20 = arith.constant dense<0.000000e+00> : vector<8x128xf32>
    %27 = tpu.matmul %25, %26, %cst_20 {dimension_numbers = #tpu.dot_dimension_numbers<[1], [0], [0], [1], [0, 0, 1, 1], [], []>} : vector<8x256xbf16>, vector<256x128xbf16>, vector<8x128xf32> -> vector<8x128xf32>
    %c0_21 = arith.constant 0 : index
    %c0_22 = arith.constant 0 : index
    %28 = vector.load %arg9[%c0_21, %c0_22] : memref<1x128xf32, #tpu.memory_space<vmem>>, vector<1x128xf32>
    %29 = vector.broadcast %28 : vector<1x128xf32> to vector<8x128xf32>
    %30 = arith.addf %27, %29 : vector<8x128xf32>
    %c0_23 = arith.constant 0 : index
    %c0_24 = arith.constant 0 : index
    %31 = vector.load %arg10[%c0_23, %c0_24] : memref<8x128xf32, #tpu.memory_space<vmem>>, vector<8x128xf32>
    tpu.vector_store %arg10[%c0_23, %c0_24], %30 {strides = array<i32>} : memref<8x128xf32, #tpu.memory_space<vmem>>, vector<8x128xf32>,
    return
  }
  func.func @transform_0(%arg0: i32) -> (i32, i32) {
    %c0_i32 = arith.constant 0 : i32
    %c0_i32_0 = arith.constant 0 : i32
    return %arg0, %c0_i32 : i32, i32
  }
  func.func @transform_1(%arg0: i32) -> (i32, i32) {
    %c0_i32 = arith.constant 0 : i32
    %c0_i32_0 = arith.constant 0 : i32
    %c0_i32_1 = arith.constant 0 : i32
    return %c0_i32, %c0_i32_0 : i32, i32
  }
  func.func @transform_2(%arg0: i32) -> (i32, i32) {
    %c0_i32 = arith.constant 0 : i32
    %c0_i32_0 = arith.constant 0 : i32
    %c0_i32_1 = arith.constant 0 : i32
    return %c0_i32, %c0_i32_0 : i32, i32
  }
  func.func @transform_3(%arg0: i32) -> (i32, i32) {
    %c0_i32 = arith.constant 0 : i32
    %c0_i32_0 = arith.constant 0 : i32
    %c0_i32_1 = arith.constant 0 : i32
    return %c0_i32, %c0_i32_0 : i32, i32
  }
  func.func @transform_4(%arg0: i32) -> (i32, i32) {
    %c0_i32 = arith.constant 0 : i32
    %c0_i32_0 = arith.constant 0 : i32
    %c0_i32_1 = arith.constant 0 : i32
    return %c0_i32, %c0_i32_0 : i32, i32
  }
  func.func @transform_5(%arg0: i32) -> (i32, i32) {
    %c0_i32 = arith.constant 0 : i32
    %c0_i32_0 = arith.constant 0 : i32
    %c0_i32_1 = arith.constant 0 : i32
    return %c0_i32, %c0_i32_0 : i32, i32
  }
  func.func @transform_6(%arg0: i32) -> (i32, i32) {
    %c0_i32 = arith.constant 0 : i32
    %c0_i32_0 = arith.constant 0 : i32
    %c0_i32_1 = arith.constant 0 : i32
    return %c0_i32, %c0_i32_0 : i32, i32
  }
  func.func @transform_7(%arg0: i32) -> (i32, i32) {
    %c0_i32 = arith.constant 0 : i32
    %c0_i32_0 = arith.constant 0 : i32
    %c0_i32_1 = arith.constant 0 : i32
    return %c0_i32, %c0_i32_0 : i32, i32
  }
  func.func @transform_8(%arg0: i32) -> (i32, i32) {
    %c0_i32 = arith.constant 0 : i32
    %c0_i32_0 = arith.constant 0 : i32
    %c0_i32_1 = arith.constant 0 : i32
    return %c0_i32, %c0_i32_0 : i32, i32
  }
  func.func @transform_9(%arg0: i32) -> (i32, i32) {
    %c0_i32 = arith.constant 0 : i32
    %c0_i32_0 = arith.constant 0 : i32
    return %arg0, %c0_i32 : i32, i32
  }
}

</mosaic_0001>

<bundles_post_ra>
// kernel: tpu_custom_call.1
= control target key start
LH: loop header
LB: loop body
LE: loop exit
PB: predicated region body
PF: predicated region fallthrough
CT: control target
= control target key end

     0   :  { %14 = vsyncpa [#allocation3], 0  ;;  %s2459_s0 = inlined_call_operand.hbm [shape: f32[8,32], index: 0, kind: input, shape index: {}]   ;;  %s2460_s1 = inlined_call_operand.hbm [shape: bf16[32,256], index: 1, kind: input, shape index: {}]   ;;  %s2461_s2 = inlined_call_operand.hbm [shape: f32[1,256], index: 2, kind: input, shape index: {}]   ;;  %s2462_s3 = inlined_call_operand.hbm [shape: bf16[256,512], index: 3, kind: input, shape index: {}]   ;;  %s2463_s4 = inlined_call_operand.hbm [shape: f32[1,512], index: 4, kind: input, shape index: {}]   ;;  %s2464_s5 = inlined_call_operand.hbm [shape: bf16[512,256], index: 5, kind: input, shape index: {}]   ;;  %s2465_s6 = inlined_call_operand.vmem [shape: f32[1,256], index: 6, kind: input, shape index: {}]   ;;  %s2466_s7 = inlined_call_operand.hbm [shape: bf16[256,128], index: 7, kind: input, shape index: {}]   ;;  %s2467_s8 = inlined_call_operand.vmem [shape: f32[1,128], index: 8, kind: input, shape index: {}]   ;;  %s2468_s9 = inlined_call_operand.hbm [shape: f32[8,128], index: 9, kind: output, shape index: {}]  }
   0x1   :  { %15 = vsyncpa [#allocation6], 0 }
   0x2   :  { %16 = vsyncpa [#allocation9], 0 }
   0x3   :  { %17 = vsyncpa [#allocation12], 0  ;;  %s34_s11 = sshll.u32 %s2460_s1, 4  ;;  %s35_s11 = int_to_ptr.hbm [resolvable:$true] %s34_s11 }
   0x4   :  { %18 = vsyncpa [#allocation4], 0  ;;  %s2345_s12 = smov [#allocation5]   ;;  %s58_s16 = sshll.u32 %s2462_s3, 4  ;;  %s59_s16 = int_to_ptr.hbm [resolvable:$true] %s58_s16 }
   0x5   :  { %s36_s13 = sshll.u32 %s2345_s12, 4  ;;  %s2346_s17 = smov 128   ;;  %s37_s13 = int_to_ptr.vmem [resolvable:$true] %s36_s13 }
   0x6   :  { %s2347_s18 = smov 8   ;;  %s2348_s19 = smov [#allocation8]  }
   0x7   :  { %42 = dma.hbm_to_vmem [thread:$0]  %s35_s11, 512, %s37_s13, [#allocation6], %s2346_s17, %s2346_s17, %s2347_s18  }
   0x8   :  { %s60_s20 = sshll.u32 %s2348_s19, 4  ;;  %s2349_s21 = smov 256   ;;  %s61_s20 = int_to_ptr.vmem [resolvable:$true] %s60_s20 }
   0x9   :  { %s2350_s22 = smov 16   ;;  %s82_s24 = sshll.u32 %s2464_s5, 4  ;;  %s83_s24 = int_to_ptr.hbm [resolvable:$true] %s82_s24 }
   0xa   :  { %66 = dma.hbm_to_vmem [thread:$0]  %s59_s16, 8192, %s61_s20, [#allocation9], %s2349_s21, %s2349_s21, %s2350_s22  }
   0xb   :  { %s2351_s25 = smov [#allocation11]   ;;  %s24_s28 = sshll.u32 %s2459_s0, 4  ;;  %s25_s28 = int_to_ptr.hbm [resolvable:$true] %s24_s28 }
   0xc   :  { %s84_s26 = sshll.u32 %s2351_s25, 4  ;;  %s2352_s29 = smov [#allocation2]   ;;  %s85_s26 = int_to_ptr.vmem [resolvable:$true] %s84_s26 }
   0xd   :  { %90 = dma.hbm_to_vmem [thread:$0]  %s83_s24, 8192, %s85_s26, [#allocation12], %s2346_s17, %s2346_s17, %s2347_s18  }
   0xe   :  { %s26_s30 = sshll.u32 %s2352_s29, 4  ;;  %s48_s12 = sshll.u32 %s2461_s2, 4  ;;  %s27_s30 = int_to_ptr.vmem [resolvable:$true] %s26_s30  ;;  %s49_s12 = int_to_ptr.hbm [resolvable:$true] %s48_s12 }
   0xf   :  { %29 = dma.hbm_to_vmem [thread:$0]  %s25_s28, 128, %s27_s30, [#allocation3]  }
  0x10   :  { %s72_s14 = sshll.u32 %s2463_s4, 4  ;;  %s2353_s15 = smov [#allocation7]   ;;  %s73_s14 = int_to_ptr.hbm [resolvable:$true] %s72_s14 }
  0x11   :  { %s50_s16 = sshll.u32 %s2353_s15, 4  ;;  %s2354_s0 = smov [#allocation10]   ;;  %s51_s16 = int_to_ptr.vmem [resolvable:$true] %s50_s16 }
  0x12   :  { %53 = dma.hbm_to_vmem [thread:$0]  %s49_s12, 32, %s51_s16, [#allocation6]  }
  0x13   :  { %s74_s17 = sshll.u32 %s2354_s0, 4  ;;  %s97_s20 = sshll.u32 %s2466_s7, 4  ;;  %s75_s17 = int_to_ptr.vmem [resolvable:$true] %s74_s17  ;;  %s98_s20 = int_to_ptr.hbm [resolvable:$true] %s97_s20 }
  0x14   :  { %77 = dma.hbm_to_vmem [thread:$0]  %s73_s14, 64, %s75_s17, [#allocation9]  }
  0x15   :  { %s2355_s2 = smov [#allocation13]   ;;  %s2356_s22 = smov 64  }
  0x16   :  { %s99_s21 = sshll.u32 %s2355_s2, 4  ;;  %s2357_s1 = smov 4   ;;  %s100_s21 = int_to_ptr.vmem [resolvable:$true] %s99_s21 }
  0x17   :  { %105 = dma.hbm_to_vmem [thread:$0]  %s98_s20, 2048, %s100_s21, [#allocation12], %s2356_s22, %s2356_s22, %s2357_s1  }
  0x18   :  { %2335 = dma.done.wait [#allocation3], 128  }
  0x19   :  { %2336 = vsyncadd [#allocation3], 4294967168 }
  0x1a   :  { %2337 = dma.done.wait [#allocation6], 544  }
  0x1b   :  { %2338 = vsyncadd [#allocation6], 4294966752 }
  0x1c   :  { %2339 = dma.done.wait [#allocation9], 8256  }
  0x1d   :  { %2340 = vsyncadd [#allocation9], 4294959040 }
  0x1e   :  { %2341 = dma.done.wait [#allocation12], 10240  }
  0x1f   :  { %2342 = vsyncadd [#allocation12], 4294957056  ;;  %v1396_v0 = vld [vmem:[#allocation5 + $0x10] sm:$0xf]  ;;  %v1983_v1 = vld [vmem:[#allocation5 + $0x14] sm:$0xf0] }
  0x20   :  { %v1982_v2 = vld [vmem:[#allocation5 + $0x14] sm:$0xf]  ;;  %v1397_v3 = vor.u32 %v1983_v1, %v1396_v0  ;;  %v1398_v4 = vld [vmem:[#allocation5 + $0x18] sm:$0xf0]  ;;  %v1388_v5 = vld [vmem:[#allocation5] sm:$0xf] }
  0x21   :  { %v1981_v6 = vld [vmem:[#allocation5 + $0x4] sm:$0xf0]  ;;  %v1401_v7 = vor.u32 %v1982_v2, %v1398_v4  ;;  %v1980_v8 = vld [vmem:[#allocation5 + $0x4] sm:$0xf]  ;;  %v1390_v9 = vld [vmem:[#allocation5 + $0x8] sm:$0xf0] }
  0x22   :  { %v137_v10 = vld [vmem:[#allocation2] sm:$0xff]  ;;  %vm169_vm0 = vcmask 261120   ;;  %179 = vmatpush.bf16.msra.mxu0 %v1397_v3  ;;  %v1389_v11 = vor.u32 %v1981_v6, %v1388_v5  ;;  %v1518_v12 = vld [vmem:[#allocation8 + $0xe0] sm:$0xf]  ;;  %v2014_v13 = vld [vmem:[#allocation8 + $0xec] sm:$0xf0]  ;;  %v1393_v15 = vor.u32 %v1980_v8, %v1390_v9 }
  0x23   :  { %v1646_v14 = vld [vmem:[#allocation8 + $0x1e0] sm:$0xf]  ;;  %192 = vmatpush.bf16.msra.mxu1 %v1401_v7  ;;  %v1519_v16 = vor.u32 %v2014_v13, %v1518_v12  ;;  %v2046_v17 = vld [vmem:[#allocation8 + $0x1ec] sm:$0xf0]  ;;  %v2012_v18 = vld [vmem:[#allocation8 + $0xe4] sm:$0xf]  ;;  %v138_v25 = vpack.c.bf16 %v137_v10, %v137_v10 }
  0x24   :  { %v1520_v19 = vld [vmem:[#allocation8 + $0xf0] sm:$0xf0]  ;;  %v1647_v20 = vor.u32 %v2046_v17, %v1646_v14  ;;  %v2044_v22 = vld [vmem:[#allocation8 + $0x1e4] sm:$0xf]  ;;  %v1502_v24 = vld [vmem:[#allocation8 + $0xc0] sm:$0xf] }
  0x25   :  { %v1523_v21 = vor.u32 %v2012_v18, %v1520_v19  ;;  %v1648_v23 = vld [vmem:[#allocation8 + $0x1f0] sm:$0xf0]  ;;  %597 = vmatpush.bf16.msra.mxu2 %v1519_v16  ;;  %v2010_v27 = vld [vmem:[#allocation8 + $0xcc] sm:$0xf0]  ;;  %v1630_v28 = vld [vmem:[#allocation8 + $0x1c0] sm:$0xf] }
  0x26   :  { %v1651_v26 = vor.u32 %v2044_v22, %v1648_v23  ;;  %v2042_v29 = vld [vmem:[#allocation8 + $0x1cc] sm:$0xf0]  ;;  %180 = vmatpush.bf16.msra.mxu0 %v1389_v11  ;;  %610 = vmatpush.bf16.msra.mxu3 %v1647_v20  ;;  %v1503_v30 = vor.u32 %v2010_v27, %v1502_v24  ;;  %v2008_v32 = vld [vmem:[#allocation8 + $0xc4] sm:$0xf]  ;;  %v1504_v33 = vld [vmem:[#allocation8 + $0xd0] sm:$0xf0] }
  0x27   :  { %v1631_v31 = vor.u32 %v2042_v29, %v1630_v28  ;;  %v2040_v34 = vld [vmem:[#allocation8 + $0x1c4] sm:$0xf]  ;;  %193 = vmatpush.bf16.msra.mxu1 %v1393_v15  ;;  %v1507_v35 = vor.u32 %v2008_v32, %v1504_v33  ;;  %v1632_v36 = vld [vmem:[#allocation8 + $0x1d0] sm:$0xf0]  ;;  %v1486_v37 = vld [vmem:[#allocation8 + $0xa0] sm:$0xf] }
  0x28   :  { %v2006_v38 = vld [vmem:[#allocation8 + $0xac] sm:$0xf0]  ;;  %v1635_v39 = vor.u32 %v2040_v34, %v1632_v36  ;;  %v1614_v40 = vld [vmem:[#allocation8 + $0x1a0] sm:$0xf]  ;;  %v2004_v42 = vld [vmem:[#allocation8 + $0xa4] sm:$0xf] }
  0x29   :  { %v2038_v41 = vld [vmem:[#allocation8 + $0x1ac] sm:$0xf0]  ;;  %1402 = vmatmul.msk.bf16.vlgmr.msra.gmra.mxu0 %vm169_vm0, %v138_v25  ;;  %598 = vmatpush.bf16.msra.mxu2 %v1503_v30  ;;  %v1487_v43 = vor.u32 %v2006_v38, %v1486_v37  ;;  %v1488_v44 = vld [vmem:[#allocation8 + $0xb0] sm:$0xf0]  ;;  %v2036_v45 = vld [vmem:[#allocation8 + $0x1a4] sm:$0xf] }
  0x2a   :  { %623 = vmatpush.bf16.msrb.mxu0 %v1523_v21  ;;  %v1616_v46 = vld [vmem:[#allocation8 + $0x1b0] sm:$0xf0]  ;;  %1403 = vmatmul.msk.bf16.vlgmr.msra.gmra.mxu1 %vm169_vm0, %v138_v25  ;;  %v1615_v47 = vor.u32 %v2038_v41, %v1614_v40  ;;  %v1470_v48 = vld [vmem:[#allocation8 + $0x80] sm:$0xf]  ;;  %v2002_v49 = vld [vmem:[#allocation8 + $0x8c] sm:$0xf0]  ;;  %v1491_v50 = vor.u32 %v2004_v42, %v1488_v44 }
  0x2b   :  { %636 = vmatpush.bf16.msrb.mxu1 %v1651_v26  ;;  %611 = vmatpush.bf16.msra.mxu3 %v1631_v31  ;;  %v1598_v51 = vld [vmem:[#allocation8 + $0x180] sm:$0xf]  ;;  %v2034_v52 = vld [vmem:[#allocation8 + $0x18c] sm:$0xf0]  ;;  %v1619_v53 = vor.u32 %v2036_v45, %v1616_v46  ;;  %v2000_v54 = vld [vmem:[#allocation8 + $0x84] sm:$0xf]  ;;  %v1471_v56 = vor.u32 %v2002_v49, %v1470_v48 }
  0x2c   :  { %v1472_v55 = vld [vmem:[#allocation8 + $0x90] sm:$0xf0]  ;;  %v2032_v57 = vld [vmem:[#allocation8 + $0x184] sm:$0xf]  ;;  %v1599_v59 = vor.u32 %v2034_v52, %v1598_v51  ;;  %v1454_v60 = vld [vmem:[#allocation8 + $0x60] sm:$0xf] }
  0x2d   :  { %599 = vmatpush.bf16.msra.mxu2 %v1487_v43  ;;  %v1600_v58 = vld [vmem:[#allocation8 + $0x190] sm:$0xf0]  ;;  %v1998_v61 = vld [vmem:[#allocation8 + $0x6c] sm:$0xf0]  ;;  %v1475_v62 = vor.u32 %v2000_v54, %v1472_v55  ;;  %v1582_v63 = vld [vmem:[#allocation8 + $0x160] sm:$0xf] }
  0x2e   :  { %624 = vmatpush.bf16.msrb.mxu0 %v1507_v35  ;;  %v2030_v0 = vld [vmem:[#allocation8 + $0x16c] sm:$0xf0]  ;;  %v1603_v1 = vor.u32 %v2032_v57, %v1600_v58  ;;  %v1996_v2 = vld [vmem:[#allocation8 + $0x64] sm:$0xf]  ;;  %v1456_v3 = vld [vmem:[#allocation8 + $0x70] sm:$0xf0]  ;;  %v1455_v4 = vor.u32 %v1998_v61, %v1454_v60 }
  0x2f   :  { %637 = vmatpush.bf16.msrb.mxu1 %v1635_v39  ;;  %612 = vmatpush.bf16.msra.mxu3 %v1615_v47  ;;  %v2028_v5 = vld [vmem:[#allocation8 + $0x164] sm:$0xf]  ;;  %v1584_v6 = vld [vmem:[#allocation8 + $0x170] sm:$0xf0]  ;;  %v1583_v7 = vor.u32 %v2030_v0, %v1582_v63  ;;  %v1438_v8 = vld [vmem:[#allocation8 + $0x40] sm:$0xf]  ;;  %v1459_v10 = vor.u32 %v1996_v2, %v1456_v3 }
  0x30   :  { %v1994_v9 = vld [vmem:[#allocation8 + $0x4c] sm:$0xf0]  ;;  %v1566_v11 = vld [vmem:[#allocation8 + $0x140] sm:$0xf]  ;;  %v1587_v13 = vor.u32 %v2028_v5, %v1584_v6  ;;  %v1992_v14 = vld [vmem:[#allocation8 + $0x44] sm:$0xf] }
  0x31   :  { %600 = vmatpush.bf16.msra.mxu2 %v1471_v56  ;;  %v2026_v12 = vld [vmem:[#allocation8 + $0x14c] sm:$0xf0]  ;;  %v1440_v15 = vld [vmem:[#allocation8 + $0x50] sm:$0xf0]  ;;  %v1439_v16 = vor.u32 %v1994_v9, %v1438_v8  ;;  %v2024_v17 = vld [vmem:[#allocation8 + $0x144] sm:$0xf] }
  0x32   :  { %625 = vmatpush.bf16.msrb.mxu0 %v1491_v50  ;;  %v1568_v18 = vld [vmem:[#allocation8 + $0x150] sm:$0xf0]  ;;  %v1567_v19 = vor.u32 %v2026_v12, %v1566_v11  ;;  %v1422_v20 = vld [vmem:[#allocation8 + $0x20] sm:$0xf]  ;;  %v1990_v21 = vld [vmem:[#allocation8 + $0x2c] sm:$0xf0]  ;;  %v1443_v22 = vor.u32 %v1992_v14, %v1440_v15 }
  0x33   :  { %638 = vmatpush.bf16.msrb.mxu1 %v1619_v53  ;;  %613 = vmatpush.bf16.msra.mxu3 %v1599_v59  ;;  %v1550_v23 = vld [vmem:[#allocation8 + $0x120] sm:$0xf]  ;;  %v2022_v24 = vld [vmem:[#allocation8 + $0x12c] sm:$0xf0]  ;;  %v1988_v25 = vld [vmem:[#allocation8 + $0x24] sm:$0xf]  ;;  %v1571_v26 = vor.u32 %v2024_v17, %v1568_v18  ;;  %v1423_v30 = vor.u32 %v1990_v21, %v1422_v20 }
  0x34   :  { %v1424_v27 = vld [vmem:[#allocation8 + $0x30] sm:$0xf0]  ;;  %v2020_v28 = vld [vmem:[#allocation8 + $0x124] sm:$0xf]  ;;  %v1406_v31 = vld [vmem:[#allocation8] sm:$0xf]  ;;  %v1551_v34 = vor.u32 %v2022_v24, %v1550_v23 }
  0x35   :  { %601 = vmatpush.bf16.msra.mxu2 %v1455_v4  ;;  %v1552_v29 = vld [vmem:[#allocation8 + $0x130] sm:$0xf0]  ;;  %v1986_v32 = vld [vmem:[#allocation8 + $0xc] sm:$0xf0]  ;;  %v1534_v33 = vld [vmem:[#allocation8 + $0x100] sm:$0xf]  ;;  %v1427_v38 = vor.u32 %v1988_v25, %v1424_v27 }
  0x36   :  { %626 = vmatpush.bf16.msrb.mxu0 %v1475_v62  ;;  %v2018_v35 = vld [vmem:[#allocation8 + $0x10c] sm:$0xf0]  ;;  %v1984_v36 = vld [vmem:[#allocation8 + $0x4] sm:$0xf]  ;;  %v1408_v37 = vld [vmem:[#allocation8 + $0x10] sm:$0xf0]  ;;  %v1555_v42 = vor.u32 %v2020_v28, %v1552_v29  ;;  %v1407_v46 = vor.u32 %v1986_v32, %v1406_v31 }
  0x37   :  { %639 = vmatpush.bf16.msrb.mxu1 %v1603_v1  ;;  %614 = vmatpush.bf16.msra.mxu3 %v1583_v7  ;;  %v2016_v39 = vld [vmem:[#allocation8 + $0x104] sm:$0xf]  ;;  %v1526_v40 = vld [vmem:[#allocation8 + $0xe8] sm:$0xf]  ;;  %v2015_v41 = vld [vmem:[#allocation8 + $0xf4] sm:$0xf0]  ;;  %v1535_v49 = vor.u32 %v2018_v35, %v1534_v33  ;;  %v1411_v53 = vor.u32 %v1984_v36, %v1408_v37 }
  0x38   :  { %v1536_v43 = vld [vmem:[#allocation8 + $0x110] sm:$0xf0]  ;;  %v1654_v44 = vld [vmem:[#allocation8 + $0x1e8] sm:$0xf]  ;;  %v2047_v45 = vld [vmem:[#allocation8 + $0x1f4] sm:$0xf0]  ;;  %v1527_v50 = vor.u32 %v2015_v41, %v1526_v40 }
  0x39   :  { %602 = vmatpush.bf16.msra.mxu2 %v1439_v16  ;;  %v2013_v47 = vld [vmem:[#allocation8 + $0xec] sm:$0xf]  ;;  %v1528_v48 = vld [vmem:[#allocation8 + $0xf8] sm:$0xf0]  ;;  %v1655_v54 = vor.u32 %v2047_v45, %v1654_v44  ;;  %v1510_v55 = vld [vmem:[#allocation8 + $0xc8] sm:$0xf]  ;;  %v1539_v57 = vor.u32 %v2016_v39, %v1536_v43 }
  0x3a   :  { %627 = vmatpush.bf16.msrb.mxu0 %v1459_v10  ;;  %v2045_v51 = vld [vmem:[#allocation8 + $0x1ec] sm:$0xf]  ;;  %v1656_v52 = vld [vmem:[#allocation8 + $0x1f8] sm:$0xf0]  ;;  %v2011_v56 = vld [vmem:[#allocation8 + $0xd4] sm:$0xf0]  ;;  %v1531_v58 = vor.u32 %v2013_v47, %v1528_v48 }
  0x3b   :  { %640 = vmatpush.bf16.msrb.mxu1 %v1587_v13  ;;  %615 = vmatpush.bf16.msra.mxu3 %v1567_v19  ;;  %v1638_v59 = vld [vmem:[#allocation8 + $0x1c8] sm:$0xf]  ;;  %v2043_v60 = vld [vmem:[#allocation8 + $0x1d4] sm:$0xf0]  ;;  %v1659_v61 = vor.u32 %v2045_v51, %v1656_v52  ;;  %v2009_v62 = vld [vmem:[#allocation8 + $0xcc] sm:$0xf]  ;;  %v1511_v0 = vor.u32 %v2011_v56, %v1510_v55 }
  0x3c   :  { %v1512_v63 = vld [vmem:[#allocation8 + $0xd8] sm:$0xf0]  ;;  %v2041_v1 = vld [vmem:[#allocation8 + $0x1cc] sm:$0xf]  ;;  %v1639_v3 = vor.u32 %v2043_v60, %v1638_v59  ;;  %v1494_v6 = vld [vmem:[#allocation8 + $0xa8] sm:$0xf] }
  0x3d   :  { %603 = vmatpush.bf16.msra.mxu2 %v1423_v30  ;;  %v1640_v2 = vld [vmem:[#allocation8 + $0x1d8] sm:$0xf0]  ;;  %v1515_v4 = vor.u32 %v2009_v62, %v1512_v63  ;;  %v2007_v7 = vld [vmem:[#allocation8 + $0xb4] sm:$0xf0]  ;;  %v1622_v8 = vld [vmem:[#allocation8 + $0x1a8] sm:$0xf] }
  0x3e   :  { %628 = vmatpush.bf16.msrb.mxu0 %v1443_v22  ;;  %v1643_v5 = vor.u32 %v2041_v1, %v1640_v2  ;;  %v1495_v9 = vor.u32 %v2007_v7, %v1494_v6  ;;  %v2039_v10 = vld [vmem:[#allocation8 + $0x1b4] sm:$0xf0]  ;;  %v2005_v11 = vld [vmem:[#allocation8 + $0xac] sm:$0xf]  ;;  %v1496_v12 = vld [vmem:[#allocation8 + $0xb8] sm:$0xf0] }
  0x3f   :  { %641 = vmatpush.bf16.msrb.mxu1 %v1571_v26  ;;  %616 = vmatpush.bf16.msra.mxu3 %v1551_v34  ;;  %v1623_v13 = vor.u32 %v2039_v10, %v1622_v8  ;;  %v1499_v14 = vor.u32 %v2005_v11, %v1496_v12  ;;  %v2037_v15 = vld [vmem:[#allocation8 + $0x1ac] sm:$0xf]  ;;  %v1624_v16 = vld [vmem:[#allocation8 + $0x1b8] sm:$0xf0]  ;;  %v1478_v18 = vld [vmem:[#allocation8 + $0x88] sm:$0xf] }
  0x40   :  { %v1627_v17 = vor.u32 %v2037_v15, %v1624_v16  ;;  %v2003_v19 = vld [vmem:[#allocation8 + $0x94] sm:$0xf0]  ;;  %v1606_v20 = vld [vmem:[#allocation8 + $0x188] sm:$0xf]  ;;  %v2001_v23 = vld [vmem:[#allocation8 + $0x8c] sm:$0xf] }
  0x41   :  { %604 = vmatpush.bf16.msra.mxu2 %v1407_v46  ;;  %v1479_v21 = vor.u32 %v2003_v19, %v1478_v18  ;;  %v2035_v22 = vld [vmem:[#allocation8 + $0x194] sm:$0xf0]  ;;  %v1480_v24 = vld [vmem:[#allocation8 + $0x98] sm:$0xf0]  ;;  %v2033_v27 = vld [vmem:[#allocation8 + $0x18c] sm:$0xf] }
  0x42   :  { %629 = vmatpush.bf16.msrb.mxu0 %v1427_v38  ;;  %v1607_v25 = vor.u32 %v2035_v22, %v1606_v20  ;;  %v1483_v26 = vor.u32 %v2001_v23, %v1480_v24  ;;  %v1608_v28 = vld [vmem:[#allocation8 + $0x198] sm:$0xf0]  ;;  %v1462_v30 = vld [vmem:[#allocation8 + $0x68] sm:$0xf]  ;;  %v1999_v31 = vld [vmem:[#allocation8 + $0x74] sm:$0xf0] }
  0x43   :  { %642 = vmatpush.bf16.msrb.mxu1 %v1555_v42  ;;  %617 = vmatpush.bf16.msra.mxu3 %v1535_v49  ;;  %v1611_v29 = vor.u32 %v2033_v27, %v1608_v28  ;;  %v1590_v32 = vld [vmem:[#allocation8 + $0x168] sm:$0xf]  ;;  %v1463_v33 = vor.u32 %v1999_v31, %v1462_v30  ;;  %v2031_v34 = vld [vmem:[#allocation8 + $0x174] sm:$0xf0]  ;;  %v1997_v35 = vld [vmem:[#allocation8 + $0x6c] sm:$0xf] }
  0x44   :  { %v1464_v36 = vld [vmem:[#allocation8 + $0x78] sm:$0xf0]  ;;  %v1591_v37 = vor.u32 %v2031_v34, %v1590_v32  ;;  %v2029_v39 = vld [vmem:[#allocation8 + $0x16c] sm:$0xf]  ;;  %v1446_v42 = vld [vmem:[#allocation8 + $0x48] sm:$0xf] }
  0x45   :  { %649 = vmatpush.bf16.msrb.mxu2 %v1527_v50  ;;  %v1467_v38 = vor.u32 %v1997_v35, %v1464_v36  ;;  %v1592_v40 = vld [vmem:[#allocation8 + $0x178] sm:$0xf0]  ;;  %v1995_v43 = vld [vmem:[#allocation8 + $0x54] sm:$0xf0]  ;;  %v1574_v44 = vld [vmem:[#allocation8 + $0x148] sm:$0xf] }
  0x46   :  { %630 = vmatpush.bf16.msrb.mxu0 %v1411_v53  ;;  %v1595_v41 = vor.u32 %v2029_v39, %v1592_v40  ;;  %v1447_v45 = vor.u32 %v1995_v43, %v1446_v42  ;;  %v2027_v46 = vld [vmem:[#allocation8 + $0x154] sm:$0xf0]  ;;  %v1993_v47 = vld [vmem:[#allocation8 + $0x4c] sm:$0xf]  ;;  %v1448_v48 = vld [vmem:[#allocation8 + $0x58] sm:$0xf0] }
  0x47   :  { %662 = vmatpush.bf16.msrb.mxu3 %v1655_v54  ;;  %643 = vmatpush.bf16.msrb.mxu1 %v1539_v57  ;;  %v1575_v49 = vor.u32 %v2027_v46, %v1574_v44  ;;  %v1451_v50 = vor.u32 %v1993_v47, %v1448_v48  ;;  %v2025_v51 = vld [vmem:[#allocation8 + $0x14c] sm:$0xf]  ;;  %v1576_v52 = vld [vmem:[#allocation8 + $0x158] sm:$0xf0]  ;;  %v1430_v53 = vld [vmem:[#allocation8 + $0x28] sm:$0xf] }
  0x48   :  { %v1579_v54 = vor.u32 %v2025_v51, %v1576_v52  ;;  %v1991_v55 = vld [vmem:[#allocation8 + $0x34] sm:$0xf0]  ;;  %v1558_v56 = vld [vmem:[#allocation8 + $0x128] sm:$0xf]  ;;  %v1989_v59 = vld [vmem:[#allocation8 + $0x2c] sm:$0xf] }
  0x49   :  { %650 = vmatpush.bf16.msrb.mxu2 %v1511_v0  ;;  %v2023_v57 = vld [vmem:[#allocation8 + $0x134] sm:$0xf0]  ;;  %v1432_v60 = vld [vmem:[#allocation8 + $0x38] sm:$0xf0]  ;;  %v1414_v1 = vld [vmem:[#allocation8 + $0x8] sm:$0xf] }
  0x4a   :  { %675 = vmatpush.bf16.msra.mxu0 %v1531_v58  ;;  %v1431_v58 = vor.u32 %v1991_v55, %v1430_v53  ;;  %v1559_v62 = vor.u32 %v2023_v57, %v1558_v56  ;;  %v1435_v63 = vor.u32 %v1989_v59, %v1432_v60  ;;  %v1560_v0 = vld [vmem:[#allocation8 + $0x138] sm:$0xf0]  ;;  %v1987_v2 = vld [vmem:[#allocation8 + $0x14] sm:$0xf0]  ;;  %v1985_v6 = vld [vmem:[#allocation8 + $0xc] sm:$0xf] }
  0x4b   :  { %688 = vmatpush.bf16.msra.mxu1 %v1659_v61  ;;  %663 = vmatpush.bf16.msrb.mxu3 %v1639_v3  ;;  %v2021_v61 = vld [vmem:[#allocation8 + $0x12c] sm:$0xf]  ;;  %v1416_v7 = vld [vmem:[#allocation8 + $0x18] sm:$0xf0]  ;;  %v1415_v10 = vor.u32 %v1987_v2, %v1414_v1  ;;  %v1782_v20 = vld [vmem:[#allocation11 + $0xf0] sm:$0xf] }
  0x4c   :  { %v1563_v3 = vor.u32 %v2021_v61, %v1560_v0  ;;  %v2017_v8 = vld [vmem:[#allocation8 + $0x10c] sm:$0xf]  ;;  %v1419_v12 = vor.u32 %v1985_v6, %v1416_v7  ;;  %v1718_v22 = vld [vmem:[#allocation11 + $0x70] sm:$0xf]  ;;  %v2063_v24 = vld [vmem:[#allocation11 + $0x74] sm:$0xf0] }
  0x4d   :  { %651 = vmatpush.bf16.msrb.mxu2 %v1495_v9  ;;  %v1544_v9 = vld [vmem:[#allocation8 + $0x118] sm:$0xf0]  ;;  %v1846_v28 = vld [vmem:[#allocation11 + $0x170] sm:$0xf]  ;;  %v2077_v34 = vld [vmem:[#allocation11 + $0xe4] sm:$0xf0]  ;;  %v1719_v35 = vor.u32 %v2063_v24, %v1718_v22 }
  0x4e   :  { %676 = vmatpush.bf16.msra.mxu0 %v1515_v4  ;;  %v1542_v4 = vld [vmem:[#allocation8 + $0x108] sm:$0xf]  ;;  %v1902_v40 = vld [vmem:[#allocation11 + $0x1e0] sm:$0xf]  ;;  %v2109_v42 = vld [vmem:[#allocation11 + $0x1e4] sm:$0xf0] }
  0x4f   :  { %689 = vmatpush.bf16.msra.mxu1 %v1643_v5  ;;  %664 = vmatpush.bf16.msrb.mxu3 %v1623_v13  ;;  %v2019_v5 = vld [vmem:[#allocation8 + $0x114] sm:$0xf0]  ;;  %v1547_v13 = vor.u32 %v2017_v8, %v1544_v9  ;;  %v1838_v43 = vld [vmem:[#allocation11 + $0x160] sm:$0xf]  ;;  %v2093_v44 = vld [vmem:[#allocation11 + $0x164] sm:$0xf0]  ;;  %v1903_v53 = vor.u32 %v2109_v42, %v1902_v40 }
  0x50   :  { %v1543_v11 = vor.u32 %v2019_v5, %v1542_v4  ;;  %v1766_v48 = vld [vmem:[#allocation11 + $0xd0] sm:$0xf]  ;;  %v2059_v52 = vld [vmem:[#allocation11 + $0x54] sm:$0xf0]  ;;  %v1839_v55 = vor.u32 %v2093_v44, %v1838_v43  ;;  %v1758_v60 = vld [vmem:[#allocation11 + $0xc0] sm:$0xf] }
  0x51   :  { %652 = vmatpush.bf16.msrb.mxu2 %v1479_v21  ;;  %v2079_v21 = vld [vmem:[#allocation11 + $0xf4] sm:$0xf0]  ;;  %v1702_v51 = vld [vmem:[#allocation11 + $0x50] sm:$0xf]  ;;  %v2073_v61 = vld [vmem:[#allocation11 + $0xc4] sm:$0xf0] }
  0x52   :  { %677 = vmatpush.bf16.msra.mxu0 %v1499_v14  ;;  %v143_v14 = vld [vmem:[#allocation7] sm:$0x3]  ;;  %v1783_v32 = vor.u32 %v2079_v21, %v1782_v20  ;;  %v1830_v57 = vld [vmem:[#allocation11 + $0x150] sm:$0xf]  ;;  %v2057_v0 = vld [vmem:[#allocation11 + $0x44] sm:$0xf0]  ;;  %v1759_v7 = vor.u32 %v2073_v61, %v1758_v60 }
  0x53   :  { %690 = vmatpush.bf16.msra.mxu1 %v1627_v17  ;;  %665 = vmatpush.bf16.msrb.mxu3 %v1607_v25  ;;  %v145_v15 = vperm.slane %v143_v14, 0  ;;  %v146_v16 = vperm.slane %v143_v14, 1  ;;  %v1910_v25 = vld [vmem:[#allocation11 + $0x1f0] sm:$0xf]  ;;  %v2107_v56 = vld [vmem:[#allocation11 + $0x1d4] sm:$0xf0] }
  0x54   :  { %v1886_v2 = vld [vmem:[#allocation11 + $0x1c0] sm:$0xf]  ;;  %v2105_v4 = vld [vmem:[#allocation11 + $0x1c4] sm:$0xf0]  ;;  %v1750_v8 = vld [vmem:[#allocation11 + $0xb0] sm:$0xf] }
  0x55   :  { %653 = vmatpush.bf16.msrb.mxu2 %v1463_v33  ;;  %v1774_v33 = vld [vmem:[#allocation11 + $0xe0] sm:$0xf]  ;;  %v2089_v6 = vld [vmem:[#allocation11 + $0x144] sm:$0xf0]  ;;  %v1776_v42 = vld [vmem:[#allocation11 + $0xe8] sm:$0xf0] }
  0x56   :  { %678 = vmatpush.bf16.msra.mxu0 %v1483_v26  ;;  %v2111_v26 = vld [vmem:[#allocation11 + $0x1f4] sm:$0xf0]  ;;  %v1775_v47 = vor.u32 %v2077_v34, %v1774_v33  ;;  %v1822_v5 = vld [vmem:[#allocation11 + $0x140] sm:$0xf]  ;;  %v2069_v20 = vld [vmem:[#allocation11 + $0xa4] sm:$0xf0] }
  0x57   :  { %691 = vmatpush.bf16.msra.mxu1 %v1611_v29  ;;  %666 = vmatpush.bf16.msrb.mxu3 %v1591_v37  ;;  %v2095_v29 = vld [vmem:[#allocation11 + $0x174] sm:$0xf0]  ;;  %v1710_v37 = vld [vmem:[#allocation11 + $0x60] sm:$0xf]  ;;  %v1911_v39 = vor.u32 %v2111_v26, %v1910_v25  ;;  %v1823_v14 = vor.u32 %v2089_v6, %v1822_v5  ;;  %v2053_v22 = vld [vmem:[#allocation11 + $0x24] sm:$0xf0] }
  0x58   :  { %v1678_v21 = vld [vmem:[#allocation11 + $0x20] sm:$0xf]  ;;  %v1734_v25 = vld [vmem:[#allocation11 + $0x90] sm:$0xf]  ;;  %v2065_v34 = vld [vmem:[#allocation11 + $0x84] sm:$0xf0] }
  0x59   :  { %654 = vmatpush.bf16.msrb.mxu2 %v1447_v45  ;;  %v1679_v26 = vor.u32 %v2053_v22, %v1678_v21  ;;  %v2062_v44 = vld [vmem:[#allocation11 + $0x74] sm:$0xf]  ;;  %v2099_v60 = vld [vmem:[#allocation11 + $0x194] sm:$0xf0]  ;;  %v1704_v5 = vld [vmem:[#allocation11 + $0x58] sm:$0xf0] }
  0x5a   :  { %679 = vmatpush.bf16.msra.mxu0 %v1467_v38  ;;  %v2061_v38 = vld [vmem:[#allocation11 + $0x64] sm:$0xf0]  ;;  %v2068_v22 = vld [vmem:[#allocation11 + $0xa4] sm:$0xf]  ;;  %s2358_s24 = smov [#allocation14]   ;;  %s1373_s3 = sshll.u32 %s2468_s9, 4  ;;  %s1374_s3 = int_to_ptr.hbm [resolvable:$true] %s1373_s3 }
  0x5b   :  { %692 = vmatpush.bf16.msra.mxu1 %v1595_v41  ;;  %667 = vmatpush.bf16.msrb.mxu3 %v1575_v49  ;;  %v1847_v41 = vor.u32 %v2095_v29, %v1846_v28  ;;  %v2075_v49 = vld [vmem:[#allocation11 + $0xd4] sm:$0xf0]  ;;  %v1670_v28 = vld [vmem:[#allocation11 + $0x10] sm:$0xf]  ;;  %s1371_s25 = sshll.u32 %s2358_s24, 4  ;;  %s1372_s25 = int_to_ptr.vmem [resolvable:$true] %s1371_s25 }
  0x5c   :  { %v1767_v59 = vor.u32 %v2075_v49, %v1766_v48  ;;  %v2051_v29 = vld [vmem:[#allocation11 + $0x14] sm:$0xf0]  ;;  %v2101_v48 = vld [vmem:[#allocation11 + $0x1a4] sm:$0xf0] }
  0x5d   :  { %655 = vmatpush.bf16.msrb.mxu2 %v1431_v58  ;;  %v2091_v58 = vld [vmem:[#allocation11 + $0x154] sm:$0xf0]  ;;  %v1671_v33 = vor.u32 %v2051_v29, %v1670_v28  ;;  %v2081_v28 = vld [vmem:[#allocation11 + $0x104] sm:$0xf0] }
  0x5e   :  { %680 = vmatpush.bf16.msra.mxu0 %v1451_v50  ;;  %v1711_v50 = vor.u32 %v2061_v38, %v1710_v37  ;;  %v2078_v37 = vld [vmem:[#allocation11 + $0xf4] sm:$0xf]  ;;  %v1784_v38 = vld [vmem:[#allocation11 + $0xf8] sm:$0xf0] }
  0x5f   :  { %693 = vmatpush.bf16.msra.mxu1 %v1579_v54  ;;  %668 = vmatpush.bf16.msrb.mxu3 %v1559_v62  ;;  %v1894_v54 = vld [vmem:[#allocation11 + $0x1d0] sm:$0xf]  ;;  %v1703_v62 = vor.u32 %v2059_v52, %v1702_v51  ;;  %v1787_v40 = vor.u32 %v2078_v37, %v1784_v38  ;;  %v1768_v51 = vld [vmem:[#allocation11 + $0xd8] sm:$0xf0]  ;;  %v2066_v38 = vld [vmem:[#allocation11 + $0x94] sm:$0xf] }
  0x60   :  { %v1895_v1 = vor.u32 %v2107_v56, %v1894_v54  ;;  %v2087_v54 = vld [vmem:[#allocation11 + $0x134] sm:$0xf0]  ;;  %v2060_v56 = vld [vmem:[#allocation11 + $0x64] sm:$0xf] }
  0x61   :  { %656 = vmatpush.bf16.msrb.mxu2 %v1415_v10  ;;  %v2071_v10 = vld [vmem:[#allocation11 + $0xb4] sm:$0xf0] }
  0x62   :  { %681 = vmatpush.bf16.msra.mxu0 %v1435_v63  ;;  %v1694_v63 = vld [vmem:[#allocation11 + $0x40] sm:$0xf] }
  0x63   :  { %694 = vmatpush.bf16.msra.mxu1 %v1563_v3  ;;  %669 = vmatpush.bf16.msrb.mxu3 %v1543_v11  ;;  %v1831_v3 = vor.u32 %v2091_v58, %v1830_v57  ;;  %v1695_v9 = vor.u32 %v2057_v0, %v1694_v63  ;;  %v1686_v11 = vld [vmem:[#allocation11 + $0x30] sm:$0xf]  ;;  %v1712_v57 = vld [vmem:[#allocation11 + $0x68] sm:$0xf0] }
  0x64   :  { %v1715_v58 = vor.u32 %v2060_v56, %v1712_v57  ;;  %v1760_v63 = vld [vmem:[#allocation11 + $0xc8] sm:$0xf0]  ;;  %v1672_v56 = vld [vmem:[#allocation11 + $0x18] sm:$0xf0] }
  0x66   :  { %682 = vmatpush.bf16.msra.mxu0 %v1419_v12  ;;  %v2055_v12 = vld [vmem:[#allocation11 + $0x34] sm:$0xf0] }
  0x67   :  { %695 = vmatpush.bf16.msra.mxu1 %v1547_v13  ;;  %v1887_v13 = vor.u32 %v2105_v4, %v1886_v2  ;;  %v2085_v2 = vld [vmem:[#allocation11 + $0x124] sm:$0xf0]  ;;  %v2058_v4 = vld [vmem:[#allocation11 + $0x54] sm:$0xf] }
  0x68   :  { %v1707_v6 = vor.u32 %v2058_v4, %v1704_v5  ;;  %v1824_v5 = vld [vmem:[#allocation11 + $0x148] sm:$0xf0] }
  0xa6   :  { %v182_v17 = vpop.f32.mrf.mxu0 }
  0xa7   :  { %v183_v18 = vadd.f32 %v182_v17, %v145_v15  ;;  %v195_v19 = vpop.f32.mrf.mxu1  ;;  %v1878_v15 = vld [vmem:[#allocation11 + $0x1b0] sm:$0xf]  ;;  %v1751_v17 = vor.u32 %v2071_v10, %v1750_v8  ;;  %v2097_v8 = vld [vmem:[#allocation11 + $0x184] sm:$0xf0]  ;;  %v2070_v10 = vld [vmem:[#allocation11 + $0xb4] sm:$0xf] }
  0xa8   :  { %v196_v23 = vadd.f32 %v195_v19, %v146_v16  ;;  %v2103_v16 = vld [vmem:[#allocation11 + $0x1b4] sm:$0xf0]  ;;  %v1687_v19 = vor.u32 %v2055_v12, %v1686_v11  ;;  %v1752_v11 = vld [vmem:[#allocation11 + $0xb8] sm:$0xf0]  ;;  %v2110_v12 = vld [vmem:[#allocation11 + $0x1f4] sm:$0xf] }
  0xa9   :  { %v199_v27 = vmax.f32 %v183_v18, 0.0  ;;  %v1742_v18 = vld [vmem:[#allocation11 + $0xa0] sm:$0xf] }
  0xaa   :  { %v200_v30 = vmax.f32 %v196_v23, 0.0  ;;  %v1879_v23 = vor.u32 %v2103_v16, %v1878_v15  ;;  %v1743_v24 = vor.u32 %v2069_v20, %v1742_v18  ;;  %v1798_v15 = vld [vmem:[#allocation11 + $0x110] sm:$0xf]  ;;  %v2083_v16 = vld [vmem:[#allocation11 + $0x114] sm:$0xf0] }
  0xab   :  { %v2432_v31 = vpack.c.bf16 %v199_v27, %v199_v27  ;;  %v2067_v27 = vld [vmem:[#allocation11 + $0x94] sm:$0xf0]  ;;  %v1799_v18 = vor.u32 %v2083_v16, %v1798_v15  ;;  %v1696_v20 = vld [vmem:[#allocation11 + $0x48] sm:$0xf0]  ;;  %v1864_v15 = vld [vmem:[#allocation11 + $0x198] sm:$0xf0] }
  0xac   :  { %v2434_v36 = vpack.c.bf16 %v200_v30, %v200_v30  ;;  %v1735_v30 = vor.u32 %v2067_v27, %v1734_v25  ;;  %v1790_v27 = vld [vmem:[#allocation11 + $0x100] sm:$0xf]  ;;  %v2084_v16 = vld [vmem:[#allocation11 + $0x124] sm:$0xf] }
  0xad   :  { %605 = vmatmul.bf16.vlgmr.msra.gmra.mxu2 %v2432_v31  ;;  %631 = vmatmul.bf16.vlgmr.msrb.gmra.mxu0 %v2432_v31 }
  0xae   :  { %618 = vmatmul.bf16.vlgmr.msra.gmra.mxu3 %v2434_v36  ;;  %644 = vmatmul.bf16.vlgmr.msrb.gmra.mxu1 %v2434_v36  ;;  %v184_v45 = vpop.f32.mrf.mxu0 }
  0xaf   :  { %v197_v46 = vpop.f32.mrf.mxu1  ;;  %1112 = vmatpush.bf16.msra.mxu3 %v1783_v32  ;;  %1099 = vmatpush.bf16.msra.mxu2 %v1719_v35  ;;  %v1726_v32 = vld [vmem:[#allocation11 + $0x80] sm:$0xf]  ;;  %v2049_v35 = vld [vmem:[#allocation11 + $0x4] sm:$0xf0]  ;;  %v1720_v45 = vld [vmem:[#allocation11 + $0x78] sm:$0xf0] }
  0xb0   :  { %1138 = vmatpush.bf16.msrb.mxu1 %v1911_v39  ;;  %1125 = vmatpush.bf16.msrb.mxu0 %v1847_v41  ;;  %v2076_v41 = vld [vmem:[#allocation11 + $0xe4] sm:$0xf]  ;;  %v1723_v46 = vor.u32 %v2062_v44, %v1720_v45  ;;  %v1680_v44 = vld [vmem:[#allocation11 + $0x28] sm:$0xf0] }
  0xb1   :  { %v1779_v43 = vor.u32 %v2076_v41, %v1776_v42  ;;  %v1896_v41 = vld [vmem:[#allocation11 + $0x1d8] sm:$0xf0]  ;;  %v2092_v45 = vld [vmem:[#allocation11 + $0x164] sm:$0xf] }
  0xb3   :  { %1113 = vmatpush.bf16.msra.mxu3 %v1775_v47  ;;  %1100 = vmatpush.bf16.msra.mxu2 %v1711_v50  ;;  %v1870_v47 = vld [vmem:[#allocation11 + $0x1a0] sm:$0xf]  ;;  %v2074_v50 = vld [vmem:[#allocation11 + $0xd4] sm:$0xf] }
  0xb4   :  { %1139 = vmatpush.bf16.msrb.mxu1 %v1903_v53  ;;  %1126 = vmatpush.bf16.msrb.mxu0 %v1839_v55  ;;  %v1871_v49 = vor.u32 %v2101_v48, %v1870_v47  ;;  %v1771_v52 = vor.u32 %v2074_v50, %v1768_v51  ;;  %v1814_v53 = vld [vmem:[#allocation11 + $0x130] sm:$0xf]  ;;  %v1840_v47 = vld [vmem:[#allocation11 + $0x168] sm:$0xf0]  ;;  %v2104_v51 = vld [vmem:[#allocation11 + $0x1c4] sm:$0xf] }
  0xb5   :  { %v1815_v55 = vor.u32 %v2087_v54, %v1814_v53  ;;  %v1843_v48 = vor.u32 %v2092_v45, %v1840_v47  ;;  %v1728_v50 = vld [vmem:[#allocation11 + $0x88] sm:$0xf0]  ;;  %v2119_v47 = vld [vmem:[#allocation13 + $0x38] sm:$0xff] }
  0xb6   :  { %v1888_v53 = vld [vmem:[#allocation11 + $0x1c8] sm:$0xf0] }
  0xb7   :  { %1114 = vmatpush.bf16.msra.mxu3 %v1767_v59  ;;  %1101 = vmatpush.bf16.msra.mxu2 %v1703_v62  ;;  %v1862_v59 = vld [vmem:[#allocation11 + $0x190] sm:$0xf]  ;;  %v2072_v62 = vld [vmem:[#allocation11 + $0xc4] sm:$0xf]  ;;  %v1891_v54 = vor.u32 %v2104_v51, %v1888_v53 }
  0xb8   :  { %1140 = vmatpush.bf16.msrb.mxu1 %v1895_v1  ;;  %1127 = vmatpush.bf16.msrb.mxu0 %v1831_v3  ;;  %v1863_v61 = vor.u32 %v2099_v60, %v1862_v59  ;;  %v1763_v0 = vor.u32 %v2072_v62, %v1760_v63  ;;  %v1806_v1 = vld [vmem:[#allocation11 + $0x120] sm:$0xf]  ;;  %v1832_v59 = vld [vmem:[#allocation11 + $0x158] sm:$0xf0]  ;;  %v2118_v51 = vld [vmem:[#allocation13 + $0x30] sm:$0xff] }
  0xb9   :  { %v1807_v3 = vor.u32 %v2085_v2, %v1806_v1  ;;  %v1880_v62 = vld [vmem:[#allocation11 + $0x1b8] sm:$0xf0]  ;;  %v2048_v1 = vld [vmem:[#allocation11 + $0x4] sm:$0xf]  ;;  %v1664_v2 = vld [vmem:[#allocation11 + $0x8] sm:$0xf0] }
  0xba   :  { %v2444_v63 = vld [vmem:[#allocation10] sm:$0xf]  ;;  %v1667_v4 = vor.u32 %v2048_v1, %v1664_v2 }
  0xbb   :  { %1115 = vmatpush.bf16.msra.mxu3 %v1759_v7  ;;  %1102 = vmatpush.bf16.msra.mxu2 %v1695_v9  ;;  %v1854_v7 = vld [vmem:[#allocation11 + $0x180] sm:$0xf]  ;;  %v271_v53 = vperm.slane %v2444_v63, 2 }
  0xbc   :  { %1141 = vmatpush.bf16.msrb.mxu1 %v1887_v13  ;;  %1128 = vmatpush.bf16.msrb.mxu0 %v1823_v14  ;;  %v1855_v9 = vor.u32 %v2097_v8, %v1854_v7  ;;  %v1755_v13 = vor.u32 %v2070_v10, %v1752_v11  ;;  %v1912_v14 = vld [vmem:[#allocation11 + $0x1f8] sm:$0xf0]  ;;  %v2100_v7 = vld [vmem:[#allocation11 + $0x1a4] sm:$0xf]  ;;  %v1872_v8 = vld [vmem:[#allocation11 + $0x1a8] sm:$0xf0] }
  0xbd   :  { %657 = vmatmul.bf16.vlgmr.msrb.gmra.mxu2 %v2432_v31  ;;  %683 = vmatmul.bf16.vlgmr.msra.gmra.mxu0 %v2432_v31  ;;  %v1662_v31 = vld [vmem:[#allocation11] sm:$0xf]  ;;  %v1875_v10 = vor.u32 %v2100_v7, %v1872_v8  ;;  %v2086_v11 = vld [vmem:[#allocation11 + $0x134] sm:$0xf]  ;;  %v2113_v8 = vld [vmem:[#allocation13 + $0x8] sm:$0xff] }
  0xbe   :  { %670 = vmatmul.bf16.vlgmr.msrb.gmra.mxu3 %v2434_v36  ;;  %696 = vmatmul.bf16.vlgmr.msra.gmra.mxu1 %v2434_v36  ;;  %v1727_v36 = vor.u32 %v2065_v34, %v1726_v32  ;;  %v1663_v39 = vor.u32 %v2049_v35, %v1662_v31  ;;  %v2054_v32 = vld [vmem:[#allocation11 + $0x34] sm:$0xf]  ;;  %v1848_v35 = vld [vmem:[#allocation11 + $0x178] sm:$0xf0] }
  0xbf   :  { %1116 = vmatpush.bf16.msra.mxu3 %v1751_v17  ;;  %1103 = vmatpush.bf16.msra.mxu2 %v1687_v19  ;;  %v1915_v17 = vor.u32 %v2110_v12, %v1912_v14  ;;  %v2056_v19 = vld [vmem:[#allocation11 + $0x44] sm:$0xf]  ;;  %v2094_v34 = vld [vmem:[#allocation11 + $0x174] sm:$0xf]  ;;  %v1816_v12 = vld [vmem:[#allocation11 + $0x138] sm:$0xf0] }
  0xc0   :  { %1142 = vmatpush.bf16.msrb.mxu1 %v1879_v23  ;;  %1129 = vmatpush.bf16.msrb.mxu0 %v1815_v55  ;;  %v1699_v21 = vor.u32 %v2056_v19, %v1696_v20  ;;  %v1744_v23 = vld [vmem:[#allocation11 + $0xa8] sm:$0xf0]  ;;  %v1851_v37 = vor.u32 %v2094_v34, %v1848_v35  ;;  %v2050_v55 = vld [vmem:[#allocation11 + $0x14] sm:$0xf] }
  0xc1   :  { %v1747_v25 = vor.u32 %v2068_v22, %v1744_v23  ;;  %v1675_v57 = vor.u32 %v2050_v55, %v1672_v56  ;;  %v2098_v14 = vld [vmem:[#allocation11 + $0x194] sm:$0xf]  ;;  %v1808_v19 = vld [vmem:[#allocation11 + $0x128] sm:$0xf0]  ;;  %v2096_v22 = vld [vmem:[#allocation11 + $0x184] sm:$0xf] }
  0xc2   :  { %v1856_v23 = vld [vmem:[#allocation11 + $0x188] sm:$0xf0]  ;;  %v2126_v7 = vld [vmem:[#allocation13 + $0x70] sm:$0xff] }
  0xc3   :  { %1117 = vmatpush.bf16.msra.mxu3 %v1743_v24  ;;  %1104 = vmatpush.bf16.msra.mxu2 %v1679_v26  ;;  %v2108_v24 = vld [vmem:[#allocation11 + $0x1e4] sm:$0xf]  ;;  %v1904_v26 = vld [vmem:[#allocation11 + $0x1e8] sm:$0xf0] }
  0xc4   :  { %1143 = vmatpush.bf16.msrb.mxu1 %v1871_v49  ;;  %1130 = vmatpush.bf16.msrb.mxu0 %v1807_v3  ;;  %v1907_v29 = vor.u32 %v2108_v24, %v1904_v26  ;;  %v2064_v49 = vld [vmem:[#allocation11 + $0x84] sm:$0xf]  ;;  %v1811_v24 = vor.u32 %v2084_v16, %v1808_v19  ;;  %v269_v26 = vperm.slane %v2444_v63, 0  ;;  %v773_v16 = vld [vmem:[%s2465_s6] sm:$0x3] }
  0xc5   :  { %v2088_v3 = vld [vmem:[#allocation11 + $0x144] sm:$0xf]  ;;  %v775_v19 = vperm.slane %v773_v16, 0 }
  0xc7   :  { %1118 = vmatpush.bf16.msra.mxu3 %v1735_v30  ;;  %1105 = vmatpush.bf16.msra.mxu2 %v1671_v33  ;;  %v1791_v30 = vor.u32 %v2081_v28, %v1790_v27  ;;  %v1688_v33 = vld [vmem:[#allocation11 + $0x38] sm:$0xf0]  ;;  %v2082_v27 = vld [vmem:[#allocation11 + $0x114] sm:$0xf] }
  0xc8   :  { %1144 = vmatpush.bf16.msrb.mxu1 %v1863_v61  ;;  %1131 = vmatpush.bf16.msrb.mxu0 %v1799_v18  ;;  %v1691_v31 = vor.u32 %v2054_v32, %v1688_v33  ;;  %v2102_v61 = vld [vmem:[#allocation11 + $0x1b4] sm:$0xf]  ;;  %v1867_v18 = vor.u32 %v2098_v14, %v1864_v15  ;;  %v1800_v28 = vld [vmem:[#allocation11 + $0x118] sm:$0xf0]  ;;  %v2121_v15 = vld [vmem:[#allocation13 + $0x48] sm:$0xff] }
  0xc9   :  { %v1803_v33 = vor.u32 %v2082_v27, %v1800_v28 }
  0xcb   :  { %1119 = vmatpush.bf16.msra.mxu3 %v1727_v36  ;;  %1106 = vmatpush.bf16.msra.mxu2 %v1663_v39  ;;  %v1736_v36 = vld [vmem:[#allocation11 + $0x98] sm:$0xf0]  ;;  %v2106_v39 = vld [vmem:[#allocation11 + $0x1d4] sm:$0xf] }
  0xcc   :  { %1145 = vmatpush.bf16.msrb.mxu1 %v1855_v9  ;;  %1132 = vmatpush.bf16.msrb.mxu0 %v1791_v30  ;;  %v1899_v42 = vor.u32 %v2106_v39, %v1896_v41  ;;  %v270_v9 = vperm.slane %v2444_v63, 1  ;;  %v2080_v39 = vld [vmem:[#allocation11 + $0x104] sm:$0xf] }
  0xcf   :  { %1164 = vmatpush.bf16.msrb.mxu3 %v1787_v40  ;;  %1151 = vmatpush.bf16.msrb.mxu2 %v1723_v46  ;;  %v1739_v40 = vor.u32 %v2066_v38, %v1736_v36 }
  0xd0   :  { %1190 = vmatpush.bf16.msra.mxu1 %v1915_v17  ;;  %1177 = vmatpush.bf16.msra.mxu0 %v1851_v37 }
  0xd3   :  { %1165 = vmatpush.bf16.msrb.mxu3 %v1779_v43  ;;  %1152 = vmatpush.bf16.msrb.mxu2 %v1715_v58  ;;  %v2052_v43 = vld [vmem:[#allocation11 + $0x24] sm:$0xf]  ;;  %v2090_v58 = vld [vmem:[#allocation11 + $0x154] sm:$0xf] }
  0xd4   :  { %1191 = vmatpush.bf16.msra.mxu1 %v1907_v29  ;;  %v1683_v46 = vor.u32 %v2052_v43, %v1680_v44  ;;  %1178 = vmatpush.bf16.msra.mxu0 %v1843_v48  ;;  %v1835_v60 = vor.u32 %v2090_v58, %v1832_v59  ;;  %v1859_v29 = vor.u32 %v2096_v22, %v1856_v23  ;;  %v272_v44 = vperm.slane %v2444_v63, 3  ;;  %v2117_v63 = vld [vmem:[#allocation13 + $0x28] sm:$0xff] }
  0xd7   :  { %1166 = vmatpush.bf16.msrb.mxu3 %v1771_v52  ;;  %1153 = vmatpush.bf16.msrb.mxu2 %v1707_v6  ;;  %v1731_v52 = vor.u32 %v2064_v49, %v1728_v50  ;;  %v1827_v6 = vor.u32 %v2088_v3, %v1824_v5  ;;  %v2116_v3 = vld [vmem:[#allocation13 + $0x20] sm:$0xff]  ;;  %v2127_v5 = vld [vmem:[#allocation13 + $0x78] sm:$0xff] }
  0xd8   :  { %1192 = vmatpush.bf16.msra.mxu1 %v1899_v42  ;;  %1179 = vmatpush.bf16.msra.mxu0 %v1835_v60 }
  0xdb   :  { %1167 = vmatpush.bf16.msrb.mxu3 %v1763_v0  ;;  %1154 = vmatpush.bf16.msrb.mxu2 %v1699_v21  ;;  %v1883_v0 = vor.u32 %v2102_v61, %v1880_v62 }
  0xdc   :  { %1193 = vmatpush.bf16.msra.mxu1 %v1891_v54  ;;  %1180 = vmatpush.bf16.msra.mxu0 %v1827_v6  ;;  %v2114_v6 = vld [vmem:[#allocation13 + $0x10] sm:$0xff] }
  0xdf   :  { %1168 = vmatpush.bf16.msrb.mxu3 %v1755_v13  ;;  %1155 = vmatpush.bf16.msrb.mxu2 %v1691_v31  ;;  %v1819_v13 = vor.u32 %v2086_v11, %v1816_v12  ;;  %v2124_v11 = vld [vmem:[#allocation13 + $0x60] sm:$0xff]  ;;  %v2123_v12 = vld [vmem:[#allocation13 + $0x58] sm:$0xff] }
  0xe0   :  { %1194 = vmatpush.bf16.msra.mxu1 %v1883_v0 }
  0xe1   :  { %1181 = vmatpush.bf16.msra.mxu0 %v1819_v13  ;;  %v2122_v13 = vld [vmem:[#allocation13 + $0x50] sm:$0xff] }
  0xe3   :  { %1169 = vmatpush.bf16.msrb.mxu3 %v1747_v25  ;;  %1156 = vmatpush.bf16.msrb.mxu2 %v1683_v46 }
  0xe4   :  { %1195 = vmatpush.bf16.msra.mxu1 %v1875_v10  ;;  %v2112_v10 = vld [vmem:[#allocation13] sm:$0xff] }
  0xe5   :  { %1182 = vmatpush.bf16.msra.mxu0 %v1811_v24 }
  0xe7   :  { %1170 = vmatpush.bf16.msrb.mxu3 %v1739_v40  ;;  %1157 = vmatpush.bf16.msrb.mxu2 %v1675_v57  ;;  %v1792_v40 = vld [vmem:[#allocation11 + $0x108] sm:$0xf0] }
  0xe8   :  { %1196 = vmatpush.bf16.msra.mxu1 %v1867_v18  ;;  %v1795_v41 = vor.u32 %v2080_v39, %v1792_v40 }
  0xe9   :  { %1183 = vmatpush.bf16.msra.mxu0 %v1803_v33 }
  0xeb   :  { %1171 = vmatpush.bf16.msrb.mxu3 %v1731_v52  ;;  %1158 = vmatpush.bf16.msrb.mxu2 %v1667_v4  ;;  %v2115_v4 = vld [vmem:[#allocation13 + $0x18] sm:$0xff] }
  0xec   :  { %1197 = vmatpush.bf16.msra.mxu1 %v1859_v29 }
  0xed   :  { %1184 = vmatpush.bf16.msra.mxu0 %v1795_v41 }
 0x12a   :  { %v632_v17 = vpop.f32.mrf.mxu0 }
 0x12b   :  { %v633_v20 = vadd.f32 %v632_v17, %v270_v9  ;;  %v645_v21 = vpop.f32.mrf.mxu1  ;;  %v2125_v9 = vld [vmem:[#allocation13 + $0x68] sm:$0xff]  ;;  %v2120_v17 = vld [vmem:[#allocation13 + $0x40] sm:$0xff] }
 0x12d   :  { %v646_v25 = vadd.f32 %v645_v21, %v633_v20 }
 0x12f   :  { %v702_v30 = vmax.f32 %v646_v25, 0.0 }
 0x130   :  { %v606_v32 = vpop.f32.mrf.mxu2 }
 0x131   :  { %v706_v34 = vpack.c.bf16 %v702_v30, %v702_v30  ;;  %v607_v31 = vadd.f32 %v606_v32, %v269_v26  ;;  %v619_v35 = vpop.f32.mrf.mxu3 }
 0x132   :  { %v634_v37 = vpop.f32.mrf.mxu0 }
 0x133   :  { %v620_v38 = vadd.f32 %v619_v35, %v607_v31  ;;  %v647_v36 = vpop.f32.mrf.mxu1  ;;  %1120 = vmatmul.bf16.vlgmr.msra.gmra.mxu3 %v706_v34 }
 0x134   :  { %1352 = vmatpush.bf16.msra.mxu3 %v2127_v5 }
 0x135   :  { %v701_v42 = vmax.f32 %v620_v38, 0.0 }
 0x137   :  { %v705_v43 = vpack.c.bf16 %v701_v42, %v701_v42 }
 0x138   :  { %v608_v45 = vpop.f32.mrf.mxu2  ;;  %1353 = vmatpush.bf16.msra.mxu3 %v2126_v7 }
 0x139   :  { %v621_v46 = vpop.f32.mrf.mxu3  ;;  %1107 = vmatmul.bf16.vlgmr.msra.gmra.mxu2 %v705_v43 }
 0x13a   :  { %v684_v48 = vpop.f32.mrf.mxu0  ;;  %1339 = vmatpush.bf16.msra.mxu2 %v2119_v47 }
 0x13b   :  { %v685_v49 = vadd.f32 %v684_v48, %v272_v44  ;;  %v697_v50 = vpop.f32.mrf.mxu1 }
 0x13c   :  { %1354 = vmatpush.bf16.msra.mxu3 %v2125_v9 }
 0x13d   :  { %v698_v52 = vadd.f32 %v697_v50, %v685_v49  ;;  %v2142_v49 = vld [vmem:[%s2467_s8] ss:$0 sm:$0xff] }
 0x13e   :  { %1340 = vmatpush.bf16.msra.mxu2 %v2118_v51 }
 0x13f   :  { %v704_v54 = vmax.f32 %v698_v52, 0.0 }
 0x140   :  { %v658_v55 = vpop.f32.mrf.mxu2  ;;  %1355 = vmatpush.bf16.msra.mxu3 %v2124_v11 }
 0x141   :  { %v708_v56 = vpack.c.bf16 %v704_v54, %v704_v54  ;;  %v659_v57 = vadd.f32 %v658_v55, %v271_v53  ;;  %v671_v58 = vpop.f32.mrf.mxu3 }
 0x142   :  { %v686_v59 = vpop.f32.mrf.mxu0  ;;  %1341 = vmatpush.bf16.msra.mxu2 %v2117_v63 }
 0x143   :  { %v672_v60 = vadd.f32 %v671_v58, %v659_v57  ;;  %v699_v61 = vpop.f32.mrf.mxu1  ;;  %1146 = vmatmul.bf16.vlgmr.msrb.gmra.mxu1 %v708_v56  ;;  %1172 = vmatmul.bf16.vlgmr.msrb.gmra.mxu3 %v706_v34  ;;  %v776_v34 = vperm.slane %v773_v16, 1 }
 0x144   :  { %1356 = vmatpush.bf16.msra.mxu3 %v2123_v12 }
 0x145   :  { %v703_v62 = vmax.f32 %v672_v60, 0.0 }
 0x146   :  { %1342 = vmatpush.bf16.msra.mxu2 %v2116_v3 }
 0x147   :  { %v707_v0 = vpack.c.bf16 %v703_v62, %v703_v62 }
 0x148   :  { %v660_v1 = vpop.f32.mrf.mxu2  ;;  %1357 = vmatpush.bf16.msra.mxu3 %v2122_v13 }
 0x149   :  { %v673_v2 = vpop.f32.mrf.mxu3  ;;  %1133 = vmatmul.bf16.vlgmr.msrb.gmra.mxu0 %v707_v0  ;;  %1159 = vmatmul.bf16.vlgmr.msrb.gmra.mxu2 %v705_v43 }
 0x14a   :  { %1343 = vmatpush.bf16.msra.mxu2 %v2115_v4 }
 0x14c   :  { %1358 = vmatpush.bf16.msra.mxu3 %v2121_v15 }
 0x14e   :  { %1344 = vmatpush.bf16.msra.mxu2 %v2114_v6 }
 0x150   :  { %1359 = vmatpush.bf16.msra.mxu3 %v2120_v17 }
 0x152   :  { %1345 = vmatpush.bf16.msra.mxu2 %v2113_v8 }
 0x153   :  { %1198 = vmatmul.bf16.vlgmr.msra.gmra.mxu1 %v708_v56 }
 0x156   :  { %1346 = vmatpush.bf16.msra.mxu2 %v2112_v10 }
 0x159   :  { %1185 = vmatmul.bf16.vlgmr.msra.gmra.mxu0 %v707_v0 }
 0x1b6   :  { %v1121_v14 = vpop.f32.mrf.mxu3 }
 0x1bc   :  { %v1108_v18 = vpop.f32.mrf.mxu2 }
 0x1bd   :  { %v1109_v22 = vadd.f32 %v1108_v18, %v775_v19 }
 0x1be   :  { %v1123_v20 = vpop.f32.mrf.mxu3 }
 0x1bf   :  { %v1122_v24 = vadd.f32 %v1121_v14, %v1109_v22 }
 0x1c0   :  { %v1147_v21 = vpop.f32.mrf.mxu1 }
 0x1c4   :  { %v1110_v23 = vpop.f32.mrf.mxu2 }
 0x1c6   :  { %v1134_v25 = vpop.f32.mrf.mxu0  ;;  %v1173_v26 = vpop.f32.mrf.mxu3 }
 0x1c7   :  { %v1135_v27 = vadd.f32 %v1134_v25, %v1122_v24 }
 0x1c8   :  { %v1149_v28 = vpop.f32.mrf.mxu1 }
 0x1c9   :  { %v1148_v29 = vadd.f32 %v1147_v21, %v1135_v27 }
 0x1cb   :  { %v1203_v30 = vmax.f32 %v1148_v29, 0.0 }
 0x1cc   :  { %v1160_v32 = vpop.f32.mrf.mxu2 }
 0x1cd   :  { %v1205_v33 = vpack.c.bf16 %v1203_v30, %v1203_v30  ;;  %v1161_v38 = vadd.f32 %v1160_v32, %v776_v34 }
 0x1ce   :  { %v1136_v31 = vpop.f32.mrf.mxu0  ;;  %v1175_v35 = vpop.f32.mrf.mxu3 }
 0x1cf   :  { %1347 = vmatmul.bf16.vlgmr.msra.gmra.mxu2 %v1205_v33  ;;  %v1174_v39 = vadd.f32 %v1173_v26, %v1161_v38 }
 0x1d0   :  { %v1199_v37 = vpop.f32.mrf.mxu1 }
 0x1d4   :  { %v1162_v36 = vpop.f32.mrf.mxu2 }
 0x1d6   :  { %v1186_v40 = vpop.f32.mrf.mxu0 }
 0x1d7   :  { %v1187_v41 = vadd.f32 %v1186_v40, %v1174_v39 }
 0x1d8   :  { %v1201_v42 = vpop.f32.mrf.mxu1 }
 0x1d9   :  { %v1200_v43 = vadd.f32 %v1199_v37, %v1187_v41 }
 0x1db   :  { %v1204_v44 = vmax.f32 %v1200_v43, 0.0 }
 0x1dd   :  { %v1206_v45 = vpack.c.bf16 %v1204_v44, %v1204_v44 }
 0x1de   :  { %v1188_v46 = vpop.f32.mrf.mxu0 }
 0x1df   :  { %1360 = vmatmul.bf16.vlgmr.msra.gmra.mxu3 %v1206_v45 }
 0x252   :  { %v1348_v47 = vpop.f32.mrf.mxu2 }
 0x253   :  { %v1349_v50 = vadd.f32 %v2142_v49, %v1348_v47 }
 0x25a   :  { %v1350_v48 = vpop.f32.mrf.mxu2 }
 0x262   :  { %v1361_v51 = vpop.f32.mrf.mxu3 }
 0x263   :  { %v1362_v52 = vadd.f32 %v1361_v51, %v1349_v50 }
 0x265   :  { %1365 = vst [vmem:[#allocation14] sm:$0xff] %v1362_v52 }
 0x266   :  { %1376 = dma.vmem_to_hbm [thread:$0]  %s1372_s25, 128, %s1374_s3, [#allocation4]  }
 0x26a   :  { %v1363_v53 = vpop.f32.mrf.mxu3 }
 0x26b   :  { %2343 = dma.done.wait [#allocation4], 128  }
 0x26c   :  { %2344 = vsyncadd [#allocation4], 4294967168 }
 0x26d   :  { %1381 = vsyncpa [#allocation3], 1 }
 0x26e   :  { %1382 = vsyncpa [#allocation6], 1 }
 0x26f   :  { %1383 = vsyncpa [#allocation9], 1 }
 0x270   :  { %1384 = vsyncpa [#allocation12], 1 }
 0x271   :  { %1385 = vsyncpa [#allocation4], 1 }

</bundles_post_ra>
